<compile_context>
chip_gen: v7x
topology: tpu7x:2x2x1
jax: 0.10.0
libtpu: 0.0.40
codegen_flags: <defaults>
</compile_context>

<pallas_src>
from functools import partial

import jax
import jax.numpy as jnp
from jax.experimental import pallas as pl
from jax.experimental.pallas import tpu as pltpu


# --------------------------------------------------------------------------- #
# Kernel
# --------------------------------------------------------------------------- #
def aspp_pooling_kernel(x_ref, wt_ref, o_ref, acc_ref, *, inv_hw):
    """Grid: (batch blocks [parallel], C_in blocks [arbitrary / reduction]).

    x_ref  : (block_n, c_in_tile, HW)  input tile (any float dtype)
    wt_ref : (c_in_tile, C_out)        weight^T tile, f32
    o_ref  : (block_n, C_out, HW)      output tile (resident across k)
    acc_ref: (block_n, C_out)          f32 accumulator scratch
    """
    k = pl.program_id(1)

    @pl.when(k == 0)
    def _():
        acc_ref[...] = jnp.zeros_like(acc_ref)

    # Partial global-avg-pool: sum over spatial lanes (f32 accumulation).
    x = x_ref[...].astype(jnp.float32)                       # (bn, ct, HW)
    s = jnp.sum(x, axis=-1)                                  # (bn, ct)

    # Partial 1x1 conv (no bias): accumulate this C_in chunk's contribution.
    acc_ref[...] += jnp.dot(s, wt_ref[...],
                            preferred_element_type=jnp.float32)   # (bn, C_out)

    @pl.when(k == pl.num_programs(1) - 1)
    def _():
        # mean (divide by the true HW), ReLU, then the bilinear "upsample" of a
        # 1x1 map == broadcast of the single value to every pixel.
        y = jnp.maximum(acc_ref[...] * inv_hw, 0.0)          # (bn, C_out)
        o_ref[...] = jnp.broadcast_to(
            y[:, :, None], o_ref.shape).astype(o_ref.dtype)


# --------------------------------------------------------------------------- #
# Tile / VMEM planning
# --------------------------------------------------------------------------- #
def _vmem_capacity_bytes():
    try:
        return int(pltpu.get_tpu_info().vmem_capacity_bytes)
    except Exception:
        return 64 << 20  # conservative default (v7x per-TC VMEM)


def _choose_tiles(n, c_in, c_out, hw, itemsize, vmem_usable):
    """Pick (block_n, c_in_tile) so double-buffered tiles fit in VMEM."""

    def tile_bytes(bn, ct):
        # one input tile + one output tile (both in x's dtype)
        return bn * (ct * hw + c_out * hw) * itemsize

    def vmem_need(bn, ct):
        wt_t = ct * c_out * 4                  # weight^T tile (f32)
        acc = bn * c_out * 4                   # accumulator scratch
        return 2 * (tile_bytes(bn, ct) + wt_t) + acc + (1 << 20)  # dbl-buf + slack

    # C_in tile: divisor of C_in that is a multiple of 8 (layout rule) or full;
    # take the largest one that fits with block_n = 1.
    cands = sorted({c_in} | {d for d in range(8, c_in, 8) if c_in % d == 0})
    c_in_tile = cands[0]
    for d in cands:
        if vmem_need(1, d) <= vmem_usable:
            c_in_tile = d

    # Batch tile: largest divisor of N that still fits.
    divs = [d for d in range(1, n + 1) if n % d == 0]
    block_n = 1
    for d in divs:
        if vmem_need(d, c_in_tile) <= vmem_usable:
            block_n = d

    # Keep >= 2 parallel batch steps (v7x megacore: both TCs drive HBM) unless
    # the resulting per-step tile would be tiny (< ~1 MiB -> overhead dominates).
    if n >= 2 and block_n > n // 2:
        half = max(d for d in divs if d <= n // 2)
        if tile_bytes(half, c_in_tile) >= (1 << 20):
            block_n = half

    return block_n, c_in_tile, vmem_need(block_n, c_in_tile)


# --------------------------------------------------------------------------- #
# Wrapper
# --------------------------------------------------------------------------- #
def aspp_pooling_pallas(x, weight):
    """x: (N, C_in, H, W) float (NCHW); weight: (C_out, C_in) 1x1 conv, no bias."""
    N, C_in, H, W = x.shape
    C_out = weight.shape[0]
    HW = H * W

    # Free, contiguous reshapes only — no padding, no extra HBM traffic.
    x_flat = x.reshape(N, C_in, HW)
    wt = weight.T.astype(jnp.float32)                        # (C_in, C_out)

    itemsize = jnp.dtype(x.dtype).itemsize
    vmem_cap = _vmem_capacity_bytes()
    vmem_usable = int(vmem_cap * 0.85)

    block_n, c_in_tile, vmem_need = _choose_tiles(
        N, C_in, C_out, HW, itemsize, vmem_usable)
    assert vmem_need <= vmem_usable, (
        f"ASPPPooling tile does not fit VMEM even at the smallest tiling "
        f"(need {vmem_need} B, usable {vmem_usable} B); C_out*HW is too large.")

    grid = (N // block_n, C_in // c_in_tile)
    vmem_limit = int(min(max(vmem_need + (1 << 20), 32 << 20),
                         int(vmem_cap * 0.9)))

    cost = pl.CostEstimate(
        flops=2 * N * C_in * C_out + N * C_in * HW,
        transcendentals=0,
        bytes_accessed=N * HW * (C_in + C_out) * itemsize + C_in * C_out * 4,
    )

    kernel = partial(aspp_pooling_kernel, inv_hw=1.0 / float(HW))

    out = pl.pallas_call(
        kernel,
        out_shape=jax.ShapeDtypeStruct((N, C_out, HW), x.dtype),
        grid_spec=pltpu.PrefetchScalarGridSpec(
            num_scalar_prefetch=0,
            grid=grid,
            in_specs=[
                # x block: last dim = full HW (exempt from 128-divisibility).
                pl.BlockSpec((block_n, c_in_tile, HW), lambda n, k: (n, k, 0)),
                # weight^T block, tiled along C_in with the reduction axis.
                pl.BlockSpec((c_in_tile, C_out), lambda n, k: (k, 0)),
            ],
            # Output block is constant across k -> accumulator-style residency.
            out_specs=pl.BlockSpec((block_n, C_out, HW), lambda n, k: (n, 0, 0)),
            scratch_shapes=[pltpu.VMEM((block_n, C_out), jnp.float32)],
        ),
        compiler_params=pltpu.CompilerParams(
            dimension_semantics=("parallel", "arbitrary"),
            vmem_limit_bytes=vmem_limit,
        ),
        cost_estimate=cost,
    )(x_flat, wt)

    # Contiguous reshape back to NCHW — free.
    return out.reshape(N, C_out, H, W)


# --------------------------------------------------------------------------- #
# Plain-JAX reference (matches the PyTorch forward exactly)
# --------------------------------------------------------------------------- #
def aspp_pooling_reference(x, weight):
    N, C_in, H, W = x.shape
    C_out = weight.shape[0]
    avg = jnp.mean(x.astype(jnp.float32), axis=(2, 3))       # (N, C_in)
    y = jnp.maximum(avg @ weight.astype(jnp.float32).T, 0.0)  # (N, C_out)
    # F.interpolate of a 1x1 map to (H, W) broadcasts the single value.
    return jnp.broadcast_to(y[:, :, None, None], (N, C_out, H, W)).astype(x.dtype)


if __name__ == "__main__":
    key = jax.random.PRNGKey(0)
    kx, kw = jax.random.split(key)

    N, C_in, C_out, H, W = 2, 4, 8, 16, 16
    x = jax.random.normal(kx, (N, C_in, H, W), jnp.float32)
    weight = jax.random.normal(kw, (C_out, C_in), jnp.float32) * 0.1

    out = aspp_pooling_pallas(x, weight)
    out = jax.block_until_ready(out)

    ref = aspp_pooling_reference(x, weight)
    assert out.shape == (N, C_out, H, W)
    assert jnp.allclose(out, ref, atol=1e-5, rtol=1e-5), "mismatch vs reference"

    print("KERNEL_OK")
</pallas_src>

<mosaic_0001>
module attributes {stable_mosaic.version = 11 : i64} {
  func.func @aspp_pooling_kernel(%arg0: i32, %arg1: i32, %arg2: memref<2x4x256xf32, #tpu.memory_space<vmem>>, %arg3: memref<4x8xf32, #tpu.memory_space<vmem>>, %arg4: memref<2x8x256xf32, #tpu.memory_space<vmem>>, %arg5: memref<2x8xf32, #tpu.memory_space<vmem>>) attributes {dimension_semantics = [#tpu.dimension_semantics<parallel>, #tpu.dimension_semantics<arbitrary>], iteration_bounds = array<i64: 1, 1>, scalar_prefetch = 0 : i64, scratch_operands = 1 : i64, tpu.core_type = #tpu.core_type<tc>, window_params = [{transform_indices = @transform_0, window_bounds = array<i64: 2, 4, 256>}, {transform_indices = @transform_1, window_bounds = array<i64: 4, 8>}, {transform_indices = @transform_2, window_bounds = array<i64: 2, 8, 256>}]} {
    %c0_i32 = arith.constant 0 : i32
    %0 = arith.cmpi eq, %arg1, %c0_i32 : i32
    %1 = arith.extui %0 : i1 to i32
    %c0_i32_0 = arith.constant 0 : i32
    %2 = arith.cmpi ne, %1, %c0_i32_0 : i32
    scf.if %2 {
      %cst_12 = arith.constant 0.000000e+00 : f32
      %13 = vector.broadcast %cst_12 : f32 to vector<2x8xf32>
      %c0_13 = arith.constant 0 : index
      %c0_14 = arith.constant 0 : index
      %14 = vector.load %arg5[%c0_13, %c0_14] : memref<2x8xf32, #tpu.memory_space<vmem>>, vector<2x8xf32>
      tpu.vector_store %arg5[%c0_13, %c0_14], %13 {strides = array<i32>} : memref<2x8xf32, #tpu.memory_space<vmem>>, vector<2x8xf32>,
    } else {
    }
    %c0 = arith.constant 0 : index
    %c0_1 = arith.constant 0 : index
    %c0_2 = arith.constant 0 : index
    %3 = vector.load %arg2[%c0, %c0_1, %c0_2] : memref<2x4x256xf32, #tpu.memory_space<vmem>>, vector<2x4x256xf32>
    %cst = arith.constant dense<0.000000e+00> : vector<2x4xf32>
    %4 = vector.multi_reduction <add>, %3, %cst [2] : vector<2x4x256xf32> to vector<2x4xf32>
    %c0_3 = arith.constant 0 : index
    %c0_4 = arith.constant 0 : index
    %5 = vector.load %arg5[%c0_3, %c0_4] : memref<2x8xf32, #tpu.memory_space<vmem>>, vector<2x8xf32>
    %c0_5 = arith.constant 0 : index
    %c0_6 = arith.constant 0 : index
    %6 = vector.load %arg3[%c0_5, %c0_6] : memref<4x8xf32, #tpu.memory_space<vmem>>, vector<4x8xf32>
    %cst_7 = arith.constant dense<0.000000e+00> : vector<2x8xf32>
    %7 = tpu.matmul %4, %6, %cst_7 {dimension_numbers = #tpu.dot_dimension_numbers<[1], [0], [0], [1], [0, 0, 1, 1], [], []>} : vector<2x4xf32>, vector<4x8xf32>, vector<2x8xf32> -> vector<2x8xf32>
    %8 = arith.addf %5, %7 : vector<2x8xf32>
    %c0_8 = arith.constant 0 : index
    %c0_9 = arith.constant 0 : index
    %9 = vector.load %arg5[%c0_8, %c0_9] : memref<2x8xf32, #tpu.memory_space<vmem>>, vector<2x8xf32>
    tpu.vector_store %arg5[%c0_8, %c0_9], %8 {strides = array<i32>} : memref<2x8xf32, #tpu.memory_space<vmem>>, vector<2x8xf32>,
    %c0_i32_10 = arith.constant 0 : i32
    %10 = arith.cmpi eq, %arg1, %c0_i32_10 : i32
    %11 = arith.extui %10 : i1 to i32
    %c0_i32_11 = arith.constant 0 : i32
    %12 = arith.cmpi ne, %11, %c0_i32_11 : i32
    scf.if %12 {
      %c0_12 = arith.constant 0 : index
      %c0_13 = arith.constant 0 : index
      %13 = vector.load %arg5[%c0_12, %c0_13] : memref<2x8xf32, #tpu.memory_space<vmem>>, vector<2x8xf32>
      %cst_14 = arith.constant 3.906250e-03 : f32
      %14 = vector.broadcast %cst_14 : f32 to vector<2x8xf32>
      %15 = arith.mulf %13, %14 : vector<2x8xf32>
      %cst_15 = arith.constant 0.000000e+00 : f32
      %16 = vector.broadcast %cst_15 : f32 to vector<2x8xf32>
      %17 = arith.maximumf %15, %16 : vector<2x8xf32>
      %18 = vector.shape_cast %17 : vector<2x8xf32> to vector<2x8x1xf32>
      %19 = vector.shape_cast %18 : vector<2x8x1xf32> to vector<2x8x1xf32>
      %20 = vector.broadcast %19 : vector<2x8x1xf32> to vector<2x8x256xf32>
      %c0_16 = arith.constant 0 : index
      %c0_17 = arith.constant 0 : index
      %c0_18 = arith.constant 0 : index
      %21 = vector.load %arg4[%c0_16, %c0_17, %c0_18] : memref<2x8x256xf32, #tpu.memory_space<vmem>>, vector<2x8x256xf32>
      tpu.vector_store %arg4[%c0_16, %c0_17, %c0_18], %20 {strides = array<i32>} : memref<2x8x256xf32, #tpu.memory_space<vmem>>, vector<2x8x256xf32>,
    } else {
    }
    return
  }
  func.func @transform_0(%arg0: i32, %arg1: i32) -> (i32, i32, i32) {
    %c0_i32 = arith.constant 0 : i32
    %c0_i32_0 = arith.constant 0 : i32
    return %arg0, %arg1, %c0_i32 : i32, i32, i32
  }
  func.func @transform_1(%arg0: i32, %arg1: i32) -> (i32, i32) {
    %c0_i32 = arith.constant 0 : i32
    %c0_i32_0 = arith.constant 0 : i32
    return %arg1, %c0_i32 : i32, i32
  }
  func.func @transform_2(%arg0: i32, %arg1: i32) -> (i32, i32, i32) {
    %c0_i32 = arith.constant 0 : i32
    %c0_i32_0 = arith.constant 0 : i32
    %c0_i32_1 = arith.constant 0 : i32
    return %arg0, %c0_i32, %c0_i32_0 : i32, i32, i32
  }
}

</mosaic_0001>

<bundles_post_ra>
// kernel: tpu_custom_call.1
= control target key start
LH: loop header
LB: loop body
LE: loop exit
PB: predicated region body
PF: predicated region fallthrough
CT: control target
= control target key end

     0   :  { %7 = vsyncpa [#allocation4], 0  ;;  %s359_s0 = inlined_call_operand.hbm [shape: f32[2,4,256], index: 0, kind: input, shape index: {}]   ;;  %s360_s1 = inlined_call_operand.hbm [shape: f32[4,8], index: 1, kind: input, shape index: {}]   ;;  %s361_s2 = inlined_call_operand.hbm [shape: f32[2,8,256], index: 2, kind: output, shape index: {}]  }
   0x1   :  { %8 = vsyncpa [#allocation7], 0 }
   0x2   :  { %9 = vsyncpa [#allocation5], 0  ;;  %s292_s9 = smov [#allocation3]   ;;  %s220_s13 = scalar_lea.hbm %s359_s0, 256 }
   0x3   :  { %s15_s10 = sshll.u32 %s292_s9, 4  ;;  %p221_p0 = scmp.ne.s32.totalorder %s359_s0, %s220_s13  ;;  %s16_s10 = int_to_ptr.vmem [resolvable:$true] %s15_s10 }
   0x4   :  { %p224_p1 = scmp.lt.u32.totalorder %s220_s13, %s359_s0 }
   0x6   :  { %p226_p2 = pnand %p224_p1, %p221_p0 }
   0x8   :  { %229 = shalt.err (!%p226_p2)
}
   0x9   :  { %s230_s18 = scalar_lea.vmem %s16_s10, 256  ;;  %p235_p4 = scmp.lt.s32.totalorder %s16_s10, %s16_s10 }
   0xa   :  { %p231_p3 = scmp.ne.s32.totalorder %s16_s10, %s230_s18  ;;  %p236_p5 = scmp.lt.s32.totalorder %s230_s18, %s230_s18 }
   0xc   :  { %p237_p6 = por %p236_p5, %p235_p4 }
   0xe   :  { %p238_p7 = pnand %p237_p6, %p231_p3 }
  0x10   :  { %241 = shalt.err (!%p238_p7)
}
  0x11   :  { %s293_s19 = smov 128   ;;  %s294_s20 = smov 8  }
  0x12   :  { %21 = dma.hbm_to_vmem [thread:$0]  %s359_s0, 256, %s16_s10, [#allocation4], %s293_s19, %s293_s19, %s294_s20  }
  0x13   :  { %s295_s23 = smov [#allocation6]   ;;  %s242_s27 = scalar_lea.hbm %s360_s1, 64 }
  0x14   :  { %s28_s24 = sshll.u32 %s295_s23, 4  ;;  %p243_p8 = scmp.ne.s32.totalorder %s360_s1, %s242_s27  ;;  %s29_s24 = int_to_ptr.vmem [resolvable:$true] %s28_s24 }
  0x15   :  { %p246_p9 = scmp.lt.u32.totalorder %s242_s27, %s360_s1 }
  0x17   :  { %p248_p10 = pnand %p246_p9, %p243_p8 }
  0x19   :  { %251 = shalt.err (!%p248_p10)
}
  0x1a   :  { %s252_s4 = scalar_lea.vmem %s29_s24, 64  ;;  %p257_p12 = scmp.lt.s32.totalorder %s29_s24, %s29_s24 }
  0x1b   :  { %p253_p11 = scmp.ne.s32.totalorder %s29_s24, %s252_s4  ;;  %p258_p13 = scmp.lt.s32.totalorder %s252_s4, %s252_s4 }
  0x1d   :  { %p259_p0 = por %p258_p13, %p257_p12 }
  0x1f   :  { %p260_p1 = pnand %p259_p0, %p253_p11 }
  0x21   :  { %263 = shalt.err (!%p260_p1)
}
  0x22   :  { %31 = dma.hbm_to_vmem [thread:$0]  %s360_s1, 64, %s29_s24, [#allocation7]  }
  0x23   :  { %286 = dma.done.wait [#allocation4], 256  }
  0x24   :  { %287 = vsyncadd [#allocation4], 4294967040 }
  0x25   :  { %288 = dma.done.wait [#allocation7], 64  }
  0x26   :  { %289 = vsyncadd [#allocation7], 4294967232  ;;  %vm52_vm0 = vcmask 1043456   ;;  %v44_v0 = vld [vmem:[#allocation3] sm:$0xff]  ;;  %v45_v1 = vld [vmem:[#allocation3 + $0x8] sm:$0xff]  ;;  %vm42_vm1 = vcmask 58368   ;;  %v67_v12 = vlaneseq }
  0x27   :  { %v48_v2 = vcombine.high %v44_v0, %v44_v0  ;;  %v53_v3 = vsel %vm52_vm0, %v44_v0, 0.0  ;;  %v49_v4 = vcombine.high %v45_v1, %v45_v1  ;;  %v58_v6 = vsel %vm52_vm0, %v45_v1, 0.0  ;;  %v64_v10 = vld [vmem:[#allocation6] sm:$0xf]  ;;  %s298_s1 = smov [#allocation8]  }
  0x28   :  { %v296_v11 = vmov 0.0   ;;  %vm297_vm2 = vmmov 0   ;;  %v68_v13 = vand.u32 127, %v67_v12  ;;  %v70_v14 = vshrl.u32 %v67_v12, 7  ;;  %s187_s6 = sshll.u32 %s298_s1, 4  ;;  %s188_s6 = int_to_ptr.vmem [resolvable:$true] %s187_s6 }
  0x29   :  { %v54_v5 = vsel %vm52_vm0, %v48_v2, 0.0  ;;  %v59_v7 = vsel %vm52_vm0, %v49_v4, 0.0  ;;  %43 = vst.msk [vmem:[#allocation2] sm:$0x3] %vm42_vm1, %v296_v11  ;;  %204 = vmatprep.subr.mxu0 %v296_v11  ;;  %206 = vmatprep.mubr.msk.f32.mxu0 %vm297_vm2, %v296_v11  ;;  %vm77_vm3 = vcmask 1041409   ;;  %vm79_vm4 = vcmask 31744   ;;  %p269_p3 = scmp.lt.s32.totalorder %s188_s6, %s188_s6 }
  0x2a   :  { %v55_v8 = vadd.f32 %v54_v5, %v53_v3  ;;  %v60_v9 = vadd.f32 %v59_v7, %v58_v6  ;;  %205 = vmatpush3.msk.msra.mxu0 %vm52_vm0, %v64_v10  ;;  %v71_v16 = vsub.s32 %v68_v13, %v70_v14  ;;  %v166_v27 = vsub.s32 0, %v70_v14  ;;  %s264_s7 = scalar_lea.vmem %s188_s6, 512 }
  0x2b   :  { %v173_v30 = vsub.s32 1, %v70_v14  ;;  %p265_p2 = scmp.ne.s32.totalorder %s188_s6, %s264_s7  ;;  %p270_p4 = scmp.lt.s32.totalorder %s264_s7, %s264_s7 }
  0x2c   :  { %56 = vadd.xlane.f32.xlu0 %v55_v8 }
  0x2d   :  { %p271_p5 = por %p270_p4, %p269_p3 }
  0x2f   :  { %p272_p6 = pnand %p271_p5, %p265_p2 }
  0x30   :  { %61 = vadd.xlane.f32.xlu0 %v60_v9  ;;  %v63_v21 = vld [vmem:[#allocation2] sm:$0x3] }
  0xb9   :  { %v57_v15 = vpop.xlane.xlu0 %56 }
  0xba   :  { %v72_v18 = vrot.slane %v57_v15, %v71_v16 }
  0xbd   :  { %v62_v17 = vpop.xlane.xlu0 %61 }
  0xbe   :  { %v76_v19 = vrot.slane %v62_v17, %v71_v16 }
  0xc0   :  { %v78_v20 = vsel %vm77_vm3, %v76_v19, %v72_v18 }
  0xc1   :  { %207 = vmatmul.mubr.msk.f32.vlgmr.msra.gmra.mrb[0].mxu0 %vm79_vm4, %v78_v20 }
 0x194   :  { %v151_v22 = vpop.f32.mrb[0].mxu0 }
 0x195   :  { %v155_v23 = vadd.f32 %v151_v22, %v63_v21  ;;  %v208_v24 = vpop.f32.mrb[1].mxu0 }
 0x197   :  { %157 = vst.msk [vmem:[#allocation2] sm:$0x3] %vm42_vm1, %v155_v23 }
 0x19e   :  { %v161_v25 = vld [vmem:[#allocation2] sm:$0x3] }
 0x19f   :  { %v162_v26 = vmul.f32 0.00390625, %v161_v25 }
 0x1a1   :  { %v163_v28 = vmax.f32 %v162_v26, 0.0 }
 0x1a3   :  { %v167_v29 = vrot.slane %v163_v28, %v166_v27  ;;  %v174_v31 = vrot.slane %v163_v28, %v173_v30 }
 0x1a5   :  { %169 = vbcast.lane.b32.xlu1 %v167_v29, 256 }
 0x1a9   :  { %176 = vbcast.lane.b32.xlu1 %v174_v31, 256 }
 0x217   :  { %v170_v32 = vpop.permute.xlu1 %169 }
 0x218   :  { %178 = vst [vmem:[#allocation8] sm:$0xff] %v170_v32  ;;  %179 = vst [vmem:[#allocation8 + $0x8] sm:$0xff] %v170_v32 }
 0x21b   :  { %v177_v33 = vpop.permute.xlu1 %176 }
 0x21c   :  { %180 = vst [vmem:[#allocation8 + $0x10] sm:$0xff] %v177_v33  ;;  %181 = vst [vmem:[#allocation8 + $0x18] sm:$0xff] %v177_v33 }
 0x21d   :  { %275 = shalt.err (!%p272_p6)
}
 0x21e   :  { %s276_s10 = scalar_lea.hbm %s361_s2, 512 }
 0x21f   :  { %p277_p7 = scmp.ne.s32.totalorder %s361_s2, %s276_s10  ;;  %p280_p8 = scmp.lt.u32.totalorder %s276_s10, %s361_s2 }
 0x221   :  { %p282_p9 = pnand %p280_p8, %p277_p7 }
 0x223   :  { %285 = shalt.err (!%p282_p9)
}
 0x224   :  { %s299_s15 = smov 256   ;;  %s300_s16 = smov 16  }
 0x225   :  { %193 = dma.vmem_to_hbm [thread:$0]  %s188_s6, 512, %s361_s2, [#allocation5], %s299_s15, %s299_s15, %s300_s16  }
 0x226   :  { %290 = dma.done.wait [#allocation5], 512  }
 0x227   :  { %291 = vsyncadd [#allocation5], 4294966784 }
 0x228   :  { %197 = vsyncpa [#allocation4], 1 }
 0x229   :  { %198 = vsyncpa [#allocation7], 1 }
 0x22a   :  { %199 = vsyncpa [#allocation5], 1 }

</bundles_post_ra>
